<compile_context>
chip_gen: v7x
topology: tpu7x:2x2x1
jax: 0.10.0
libtpu: 0.0.40
codegen_flags: <defaults>
</compile_context>

<pallas_src>
import jax
import jax.numpy as jnp
from jax import lax
from jax.experimental import pallas as pl
from jax.experimental.pallas import tpu as pltpu


def _round_up(x, m):
    return ((x + m - 1) // m) * m


def proxynet_kernel(y_ref, w_ref, out_ref):
    """One grid step: gather TB proxy rows, then L2-normalize the (TB, E) tile.

    y_ref   : (B_pad,) int32 in SMEM (scalar prefetch; class indices).
    w_ref   : (N, E)  float32 in VMEM -- full proxy table, resident across steps
              (constant index_map => DMA'd from HBM only once).
    out_ref : (TB, E) float32 in VMEM -- normalized proxies for this batch tile.
    """
    tb = out_ref.shape[0]
    base = pl.program_id(0) * tb

    # Row gather: TB dynamic sublane loads from the resident table, written
    # straight into the output tile.
    def gather_row(r, carry):
        idx = y_ref[base + r]                       # SMEM scalar read
        out_ref[pl.ds(r, 1), :] = w_ref[pl.ds(idx, 1), :]
        return carry

    lax.fori_loop(0, tb, gather_row, 0, unroll=min(tb, 8))

    # Vectorized L2 normalization over the whole tile:
    #   XLU lane-reduce + EUP rsqrt + VPU multiply (separate VLIW slots).
    rows = out_ref[...]
    inv_norm = lax.rsqrt(jnp.sum(rows * rows, axis=-1, keepdims=True))
    out_ref[...] = rows * inv_norm


def proxynet_forward(y_true, weight, *, tile_b=128):
    """Pallas equivalent of ProxyNet.forward(y_true): normalized-proxy lookup."""
    B = int(y_true.shape[0])
    N, E = weight.shape
    w = weight.astype(jnp.float32)   # keep math in f32 (v5e: no bf16 VPU/EUP)

    # Batch tile: multiple of 8 (sublane dim); single grid step for small B.
    TB = min(tile_b, _round_up(B, 8))
    B_pad = _round_up(B, TB)
    n_steps = B_pad // TB

    # Clip (untrusted-label safety: no runtime bounds check on VMEM refs) and
    # pad with a valid index 0; padded rows are sliced off below.
    y = jnp.clip(y_true.astype(jnp.int32), 0, N - 1)
    if B_pad != B:
        y = jnp.concatenate([y, jnp.zeros((B_pad - B,), jnp.int32)])

    # VMEM budget for the table-resident path: resident table + double-buffered
    # output tiles must fit the scoped VMEM even on v7x (64 MiB physical,
    # 32 MiB default scoped).  At this model's sizes this is a few KiB.
    table_bytes = N * E * 4
    tile_bytes = TB * E * 4
    assert table_bytes + 4 * tile_bytes < 32 * 1024 * 1024, (
        "proxy table too large for the VMEM-resident path")
    # TODO(synk): add a manual make_async_copy row-gather fallback (weight in
    # pl.ANY, double-buffered row DMAs) for tables that do not fit VMEM.

    grid_spec = pltpu.PrefetchScalarGridSpec(
        num_scalar_prefetch=1,          # y lands in SMEM before the grid runs
        grid=(n_steps,),
        in_specs=[
            # Full table, constant index_map -> loaded once, stays resident.
            pl.BlockSpec((N, E), lambda i, y_idx: (0, 0)),
        ],
        out_specs=pl.BlockSpec((TB, E), lambda i, y_idx: (i, 0)),
    )

    out = pl.pallas_call(
        proxynet_kernel,
        out_shape=jax.ShapeDtypeStruct((B_pad, E), jnp.float32),
        grid_spec=grid_spec,
        compiler_params=pltpu.CompilerParams(
            # Batch tiles are independent -> megacore sharding on v7x
            # (no-op on single-TC v5e/v6e).
            dimension_semantics=("parallel",),
        ),
    )(y, w)

    return out[:B] if B_pad != B else out


if __name__ == "__main__":
    # ProxyNet(n_classes=8, embedding_size=32); batch of 8 labels.
    n_classes = 8
    embedding_size = 32
    batch = 8

    key = jax.random.PRNGKey(0)
    kw, ky = jax.random.split(key)

    # Deterministic synthetic init mimicking torch.randn(n_classes, embedding_size).
    proxies_weight = jax.random.normal(
        kw, (n_classes, embedding_size), dtype=jnp.float32)
    y_true = jax.random.randint(ky, (batch,), 0, n_classes, dtype=jnp.int32)

    out = proxynet_forward(y_true, proxies_weight)
    out = jax.block_until_ready(out)

    # Pure-JAX reference: normalize rows of the table, then gather.
    w_ref = proxies_weight / jnp.linalg.norm(
        proxies_weight, axis=1, keepdims=True)
    ref = w_ref[y_true]

    assert out.shape == (batch, embedding_size)
    assert out.dtype == jnp.float32
    assert jnp.allclose(out, ref, atol=1e-5, rtol=1e-5)

    print("KERNEL_OK")
</pallas_src>

<mosaic_0001>
module attributes {stable_mosaic.version = 11 : i64} {
  func.func @proxynet_kernel(%arg0: i32, %arg1: memref<8xi32, #tpu.memory_space<smem>>, %arg2: memref<8x32xf32, #tpu.memory_space<vmem>>, %arg3: memref<8x32xf32, #tpu.memory_space<vmem>>) attributes {dimension_semantics = [#tpu.dimension_semantics<parallel>], iteration_bounds = array<i64: 1>, scalar_prefetch = 1 : i64, scratch_operands = 0 : i64, tpu.core_type = #tpu.core_type<tc>, window_params = [{pipeline_mode = #tpu.pipeline_mode<synchronous>, transform_indices = @transform_0, window_bounds = array<i64: 8, 32>}, {transform_indices = @transform_1, window_bounds = array<i64: 8, 32>}]} {
    %c8_i32 = arith.constant 8 : i32
    %0 = arith.muli %arg0, %c8_i32 : i32
    %c0_i32 = arith.constant 0 : i32
    %1 = arith.addi %0, %c0_i32 : i32
    %2 = arith.index_cast %1 : i32 to index
    %3 = memref.load %arg1[%2] : memref<8xi32, #tpu.memory_space<smem>>
    %4 = arith.index_cast %3 : i32 to index
    %c0 = arith.constant 0 : index
    %5 = vector.load %arg2[%4, %c0] : memref<8x32xf32, #tpu.memory_space<vmem>>, vector<1x32xf32>
    %6 = arith.index_cast %c0_i32 : i32 to index
    %c0_0 = arith.constant 0 : index
    %7 = vector.load %arg3[%6, %c0_0] : memref<8x32xf32, #tpu.memory_space<vmem>>, vector<1x32xf32>
    tpu.vector_store %arg3[%6, %c0_0], %5 {strides = array<i32>} : memref<8x32xf32, #tpu.memory_space<vmem>>, vector<1x32xf32>,
    %c1_i32 = arith.constant 1 : i32
    %8 = arith.addi %0, %c1_i32 : i32
    %9 = arith.index_cast %8 : i32 to index
    %10 = memref.load %arg1[%9] : memref<8xi32, #tpu.memory_space<smem>>
    %11 = arith.index_cast %10 : i32 to index
    %c0_1 = arith.constant 0 : index
    %12 = vector.load %arg2[%11, %c0_1] : memref<8x32xf32, #tpu.memory_space<vmem>>, vector<1x32xf32>
    %13 = arith.index_cast %c1_i32 : i32 to index
    %c0_2 = arith.constant 0 : index
    %14 = vector.load %arg3[%13, %c0_2] : memref<8x32xf32, #tpu.memory_space<vmem>>, vector<1x32xf32>
    tpu.vector_store %arg3[%13, %c0_2], %12 {strides = array<i32>} : memref<8x32xf32, #tpu.memory_space<vmem>>, vector<1x32xf32>,
    %c2_i32 = arith.constant 2 : i32
    %15 = arith.addi %0, %c2_i32 : i32
    %16 = arith.index_cast %15 : i32 to index
    %17 = memref.load %arg1[%16] : memref<8xi32, #tpu.memory_space<smem>>
    %18 = arith.index_cast %17 : i32 to index
    %c0_3 = arith.constant 0 : index
    %19 = vector.load %arg2[%18, %c0_3] : memref<8x32xf32, #tpu.memory_space<vmem>>, vector<1x32xf32>
    %20 = arith.index_cast %c2_i32 : i32 to index
    %c0_4 = arith.constant 0 : index
    %21 = vector.load %arg3[%20, %c0_4] : memref<8x32xf32, #tpu.memory_space<vmem>>, vector<1x32xf32>
    tpu.vector_store %arg3[%20, %c0_4], %19 {strides = array<i32>} : memref<8x32xf32, #tpu.memory_space<vmem>>, vector<1x32xf32>,
    %c3_i32 = arith.constant 3 : i32
    %22 = arith.addi %0, %c3_i32 : i32
    %23 = arith.index_cast %22 : i32 to index
    %24 = memref.load %arg1[%23] : memref<8xi32, #tpu.memory_space<smem>>
    %25 = arith.index_cast %24 : i32 to index
    %c0_5 = arith.constant 0 : index
    %26 = vector.load %arg2[%25, %c0_5] : memref<8x32xf32, #tpu.memory_space<vmem>>, vector<1x32xf32>
    %27 = arith.index_cast %c3_i32 : i32 to index
    %c0_6 = arith.constant 0 : index
    %28 = vector.load %arg3[%27, %c0_6] : memref<8x32xf32, #tpu.memory_space<vmem>>, vector<1x32xf32>
    tpu.vector_store %arg3[%27, %c0_6], %26 {strides = array<i32>} : memref<8x32xf32, #tpu.memory_space<vmem>>, vector<1x32xf32>,
    %c4_i32 = arith.constant 4 : i32
    %29 = arith.addi %0, %c4_i32 : i32
    %30 = arith.index_cast %29 : i32 to index
    %31 = memref.load %arg1[%30] : memref<8xi32, #tpu.memory_space<smem>>
    %32 = arith.index_cast %31 : i32 to index
    %c0_7 = arith.constant 0 : index
    %33 = vector.load %arg2[%32, %c0_7] : memref<8x32xf32, #tpu.memory_space<vmem>>, vector<1x32xf32>
    %34 = arith.index_cast %c4_i32 : i32 to index
    %c0_8 = arith.constant 0 : index
    %35 = vector.load %arg3[%34, %c0_8] : memref<8x32xf32, #tpu.memory_space<vmem>>, vector<1x32xf32>
    tpu.vector_store %arg3[%34, %c0_8], %33 {strides = array<i32>} : memref<8x32xf32, #tpu.memory_space<vmem>>, vector<1x32xf32>,
    %c5_i32 = arith.constant 5 : i32
    %36 = arith.addi %0, %c5_i32 : i32
    %37 = arith.index_cast %36 : i32 to index
    %38 = memref.load %arg1[%37] : memref<8xi32, #tpu.memory_space<smem>>
    %39 = arith.index_cast %38 : i32 to index
    %c0_9 = arith.constant 0 : index
    %40 = vector.load %arg2[%39, %c0_9] : memref<8x32xf32, #tpu.memory_space<vmem>>, vector<1x32xf32>
    %41 = arith.index_cast %c5_i32 : i32 to index
    %c0_10 = arith.constant 0 : index
    %42 = vector.load %arg3[%41, %c0_10] : memref<8x32xf32, #tpu.memory_space<vmem>>, vector<1x32xf32>
    tpu.vector_store %arg3[%41, %c0_10], %40 {strides = array<i32>} : memref<8x32xf32, #tpu.memory_space<vmem>>, vector<1x32xf32>,
    %c6_i32 = arith.constant 6 : i32
    %43 = arith.addi %0, %c6_i32 : i32
    %44 = arith.index_cast %43 : i32 to index
    %45 = memref.load %arg1[%44] : memref<8xi32, #tpu.memory_space<smem>>
    %46 = arith.index_cast %45 : i32 to index
    %c0_11 = arith.constant 0 : index
    %47 = vector.load %arg2[%46, %c0_11] : memref<8x32xf32, #tpu.memory_space<vmem>>, vector<1x32xf32>
    %48 = arith.index_cast %c6_i32 : i32 to index
    %c0_12 = arith.constant 0 : index
    %49 = vector.load %arg3[%48, %c0_12] : memref<8x32xf32, #tpu.memory_space<vmem>>, vector<1x32xf32>
    tpu.vector_store %arg3[%48, %c0_12], %47 {strides = array<i32>} : memref<8x32xf32, #tpu.memory_space<vmem>>, vector<1x32xf32>,
    %c7_i32 = arith.constant 7 : i32
    %50 = arith.addi %0, %c7_i32 : i32
    %51 = arith.index_cast %50 : i32 to index
    %52 = memref.load %arg1[%51] : memref<8xi32, #tpu.memory_space<smem>>
    %53 = arith.index_cast %52 : i32 to index
    %c0_13 = arith.constant 0 : index
    %54 = vector.load %arg2[%53, %c0_13] : memref<8x32xf32, #tpu.memory_space<vmem>>, vector<1x32xf32>
    %55 = arith.index_cast %c7_i32 : i32 to index
    %c0_14 = arith.constant 0 : index
    %56 = vector.load %arg3[%55, %c0_14] : memref<8x32xf32, #tpu.memory_space<vmem>>, vector<1x32xf32>
    tpu.vector_store %arg3[%55, %c0_14], %54 {strides = array<i32>} : memref<8x32xf32, #tpu.memory_space<vmem>>, vector<1x32xf32>,
    %c8_i32_15 = arith.constant 8 : i32
    %c0_16 = arith.constant 0 : index
    %c0_17 = arith.constant 0 : index
    %57 = vector.load %arg3[%c0_16, %c0_17] : memref<8x32xf32, #tpu.memory_space<vmem>>, vector<8x32xf32>
    %58 = arith.mulf %57, %57 : vector<8x32xf32>
    %cst = arith.constant dense<0.000000e+00> : vector<8xf32>
    %59 = vector.multi_reduction <add>, %58, %cst [1] : vector<8x32xf32> to vector<8xf32>
    %60 = vector.shape_cast %59 : vector<8xf32> to vector<8x1xf32>
    %61 = math.rsqrt %60 : vector<8x1xf32>
    %62 = vector.broadcast %61 : vector<8x1xf32> to vector<8x32xf32>
    %63 = arith.mulf %57, %62 : vector<8x32xf32>
    %c0_18 = arith.constant 0 : index
    %c0_19 = arith.constant 0 : index
    %64 = vector.load %arg3[%c0_18, %c0_19] : memref<8x32xf32, #tpu.memory_space<vmem>>, vector<8x32xf32>
    tpu.vector_store %arg3[%c0_18, %c0_19], %63 {strides = array<i32>} : memref<8x32xf32, #tpu.memory_space<vmem>>, vector<8x32xf32>,
    return
  }
  func.func @transform_0(%arg0: i32, %arg1: memref<8xi32, #tpu.memory_space<smem>>) -> (i32, i32) {
    %c0_i32 = arith.constant 0 : i32
    %c0_i32_0 = arith.constant 0 : i32
    %c0_i32_1 = arith.constant 0 : i32
    return %c0_i32, %c0_i32_0 : i32, i32
  }
  func.func @transform_1(%arg0: i32, %arg1: memref<8xi32, #tpu.memory_space<smem>>) -> (i32, i32) {
    %c0_i32 = arith.constant 0 : i32
    %c0_i32_0 = arith.constant 0 : i32
    return %arg0, %c0_i32 : i32, i32
  }
}

</mosaic_0001>

<bundles_post_ra>
// kernel: tpu_custom_call.1
= control target key start
LH: loop header
LB: loop body
LE: loop exit
PB: predicated region body
PF: predicated region fallthrough
CT: control target
= control target key end

     0   :  { %s233_s0 = inlined_call_operand.hbm [shape: s32[8], index: 0, kind: input, shape index: {}]   ;;  %s234_s1 = inlined_call_operand.hbm [shape: f32[8,32], index: 1, kind: input, shape index: {}]   ;;  %s235_s2 = inlined_call_operand.hbm [shape: f32[8,32], index: 2, kind: output, shape index: {}]  }
   0x1   :  { %s111_s11 = scalar_lea.hbm %s233_s0, 16 }
   0x2   :  { %p112_p0 = scmp.ne.s32.totalorder %s233_s0, %s111_s11  ;;  %p115_p1 = scmp.lt.u32.totalorder %s111_s11, %s233_s0 }
   0x4   :  { %p117_p2 = pnand %p115_p1, %p112_p0 }
   0x6   :  { %120 = shalt.err (!%p117_p2)  }
   0x7   :  { %s171_s16 = smov [#allocation3]  }
   0x8   :  { %8 = dma.hbm_to_smem %s233_s0, 16, %s171_s16, [#allocation2] }
   0x9   :  { %165 = dma.done.wait [#allocation2], 16 }
   0xa   :  { %166 = vsyncadd [#allocation2], 4294967280 }
   0xb   :  { %10 = sfence }
   0xc   :  { %11 = vsyncpa [#allocation5], 0 }
   0xd   :  { %12 = vsyncpa [#allocation6], 0  ;;  %s172_s19 = smov [#allocation4]   ;;  %s121_s23 = scalar_lea.hbm %s234_s1, 128 }
   0xe   :  { %s19_s20 = sshll.u32 %s172_s19, 4  ;;  %p122_p3 = scmp.ne.s32.totalorder %s234_s1, %s121_s23  ;;  %s20_s20 = int_to_ptr.vmem [resolvable:$true] %s19_s20 }
   0xf   :  { %p125_p4 = scmp.lt.u32.totalorder %s121_s23, %s234_s1 }
  0x11   :  { %p127_p5 = pnand %p125_p4, %p122_p3 }
  0x13   :  { %130 = shalt.err (!%p127_p5)
}
  0x14   :  { %s131_s0 = scalar_lea.vmem %s20_s20, 128  ;;  %p136_p7 = scmp.lt.s32.totalorder %s20_s20, %s20_s20 }
  0x15   :  { %p132_p6 = scmp.ne.s32.totalorder %s20_s20, %s131_s0  ;;  %p137_p8 = scmp.lt.s32.totalorder %s131_s0, %s131_s0 }
  0x17   :  { %p138_p9 = por %p137_p8, %p136_p7 }
  0x19   :  { %p139_p10 = pnand %p138_p9, %p132_p6 }
  0x1b   :  { %142 = shalt.err (!%p139_p10)
}
  0x1c   :  { %22 = dma.hbm_to_vmem [thread:$0]  %s234_s1, 128, %s20_s20, [#allocation5]  }
  0x1d   :  { %167 = dma.done.wait [#allocation5], 128  }
  0x1e   :  { %168 = vsyncadd [#allocation5], 4294967168  ;;  %s27_s30 = sld [smem:[#allocation3]]  ;;  %s99_s3 = sld [smem:[#allocation3 + $0x1]]  ;;  %vm30_vm0 = vcmask 253952   ;;  %vm69_vm1 = vcmask 261120  }
  0x1f   :  { %s100_s4 = sld [smem:[#allocation3 + $0x2]]  ;;  %s101_s5 = sld [smem:[#allocation3 + $0x3]] }
  0x20   :  { %s102_s6 = sld [smem:[#allocation3 + $0x4]]  ;;  %s103_s7 = sld [smem:[#allocation3 + $0x5]] }
  0x21   :  { %s104_s8 = sld [smem:[#allocation3 + $0x6]]  ;;  %s105_s9 = sld [smem:[#allocation3 + $0x7]] }
  0x22   :  { %s173_s17 = smov [#allocation7]  }
  0x23   :  { %s82_s18 = sshll.u32 %s173_s17, 4  ;;  %s83_s18 = int_to_ptr.vmem [resolvable:$true] %s82_s18 }
  0x24   :  { %s28_s10 = scalar_lea.vmem [#allocation4], %s27_s30  ;;  %s34_s11 = scalar_lea.vmem [#allocation4], %s99_s3 }
  0x25   :  { %v29_v0 = vld [vmem:[%s28_s10] sm:$0x1]  ;;  %s39_s1 = scalar_lea.vmem [#allocation4], %s100_s4  ;;  %s44_s12 = scalar_lea.vmem [#allocation4], %s101_s5 }
  0x26   :  { %v35_v1 = vld [vmem:[%s34_s11] sm:$0x1]  ;;  %31 = vst.msk [vmem:[#allocation7] sm:$0x1] %vm30_vm0, %v29_v0  ;;  %s49_s13 = scalar_lea.vmem [#allocation4], %s102_s6  ;;  %s54_s14 = scalar_lea.vmem [#allocation4], %s103_s7 }
  0x27   :  { %36 = vst.msk [vmem:[#allocation7 + $0x1] sm:$0x1] %vm30_vm0, %v35_v1  ;;  %v40_v2 = vld [vmem:[%s39_s1] sm:$0x1]  ;;  %s59_s15 = scalar_lea.vmem [#allocation4], %s104_s8  ;;  %s64_s16 = scalar_lea.vmem [#allocation4], %s105_s9 }
  0x28   :  { %v45_v3 = vld [vmem:[%s44_s12] sm:$0x1]  ;;  %41 = vst.msk [vmem:[#allocation7 + $0x2] sm:$0x1] %vm30_vm0, %v40_v2  ;;  %s143_s19 = scalar_lea.vmem %s83_s18, 128  ;;  %p148_p12 = scmp.lt.s32.totalorder %s83_s18, %s83_s18 }
  0x29   :  { %46 = vst.msk [vmem:[#allocation7 + $0x3] sm:$0x1] %vm30_vm0, %v45_v3  ;;  %v50_v4 = vld [vmem:[%s49_s13] sm:$0x1]  ;;  %p144_p11 = scmp.ne.s32.totalorder %s83_s18, %s143_s19  ;;  %p149_p13 = scmp.lt.s32.totalorder %s143_s19, %s143_s19 }
  0x2a   :  { %v55_v5 = vld [vmem:[%s54_s14] sm:$0x1]  ;;  %51 = vst.msk [vmem:[#allocation7 + $0x4] sm:$0x1] %vm30_vm0, %v50_v4 }
  0x2b   :  { %56 = vst.msk [vmem:[#allocation7 + $0x5] sm:$0x1] %vm30_vm0, %v55_v5  ;;  %v60_v6 = vld [vmem:[%s59_s15] sm:$0x1]  ;;  %p150_p0 = por %p149_p13, %p148_p12 }
  0x2c   :  { %v65_v7 = vld [vmem:[%s64_s16] sm:$0x1]  ;;  %61 = vst.msk [vmem:[#allocation7 + $0x6] sm:$0x1] %vm30_vm0, %v60_v6 }
  0x2d   :  { %66 = vst.msk [vmem:[#allocation7 + $0x7] sm:$0x1] %vm30_vm0, %v65_v7  ;;  %p151_p1 = pnand %p150_p0, %p144_p11 }
  0x34   :  { %v67_v8 = vld [vmem:[#allocation7] sm:$0xff] }
  0x35   :  { %v68_v9 = vmul.f32 %v67_v8, %v67_v8 }
  0x37   :  { %v70_v10 = vsel %vm69_vm1, %v68_v9, 0.0 }
  0x38   :  { %71 = vadd.xlane.f32.xlu0 %v70_v10 }
  0xc5   :  { %v72_v11 = vpop.xlane.xlu0 %71 }
  0xc6   :  { %109 = vrsqrt.f32 %v72_v11 }
  0xd0   :  { %v110_v12 = vpop.eup %109 }
  0xd1   :  { %v74_v13 = vmul.f32 %v110_v12, %v67_v8 }
  0xd3   :  { %75 = vst.msk [vmem:[#allocation7] sm:$0xff] %vm69_vm1, %v74_v13 }
  0xd4   :  { %154 = shalt.err (!%p151_p1)
}
  0xd5   :  { %s155_s22 = scalar_lea.hbm %s235_s2, 128 }
  0xd6   :  { %p156_p2 = scmp.ne.s32.totalorder %s235_s2, %s155_s22  ;;  %p159_p3 = scmp.lt.u32.totalorder %s155_s22, %s235_s2 }
  0xd8   :  { %p161_p4 = pnand %p159_p3, %p156_p2 }
  0xda   :  { %164 = shalt.err (!%p161_p4)
}
  0xdb   :  { %85 = dma.vmem_to_hbm [thread:$0]  %s83_s18, 128, %s235_s2, [#allocation6]  }
  0xdc   :  { %169 = dma.done.wait [#allocation6], 128  }
  0xdd   :  { %170 = vsyncadd [#allocation6], 4294967168 }
  0xde   :  { %89 = vsyncpa [#allocation5], 1 }
  0xdf   :  { %90 = vsyncpa [#allocation6], 1 }

</bundles_post_ra>
